<compile_context>
chip_gen: v5e
topology: v5e:2x2
jax: 0.10.0
libtpu: 0.0.40
codegen_flags: <defaults>
</compile_context>

<pallas_src>
import functools

import jax
import jax.numpy as jnp
from jax import lax
from jax.experimental import pallas as pl
from jax.experimental.pallas import tpu as pltpu


def _normalization_kernel(ab_ref, x_ref, o_ref, *, eps):
    """ab_ref: SMEM f32[2] = [alpha, beta]; x_ref/o_ref: (tile_n, C, tile_hw)."""
    # Sum of squares over the channel (sublane) axis, accumulated in f32.
    x32 = x_ref[...].astype(jnp.float32)
    sumsq = jnp.sum(x32 * x32, axis=1, keepdims=True)          # (tile_n, 1, tile_hw)
    # 1 / max(||x||, eps) == min(rsqrt(sumsq), 1/eps); rsqrt runs on the EUP.
    inv = jnp.minimum(lax.rsqrt(sumsq), jnp.float32(1.0 / eps))
    alpha = ab_ref[0]
    beta = ab_ref[1]
    scale = alpha * inv
    # Re-index x_ref for the streaming multiply-add instead of keeping the
    # full f32 copy live (VMEM headroom for sub-f32 inputs).
    o_ref[...] = (x_ref[...].astype(jnp.float32) * scale + beta).astype(o_ref.dtype)


def normalization(x, alpha, beta, *, eps=1e-12,
                  block_target_bytes=4 * 1024 * 1024):
    """x: (N, C, H, W) -> (N, C, H, W); alpha/beta: scalar (1,) parameters."""
    N, C, H, W = x.shape
    HW = H * W
    xf = x.reshape(N, C, HW)

    itemsize = jnp.dtype(x.dtype).itemsize
    # Sublane packing: 8 rows for 32-bit, 16 for 16-bit, 32 for 8-bit dtypes.
    sublane_pack = max(8, 32 // max(itemsize, 1))
    c_pad = -(-C // sublane_pack) * sublane_pack

    # --- lane tiling: prefer full HW (contiguous DMA per image) --------------
    per_hw_bytes = c_pad * itemsize
    max_hw = max(1, block_target_bytes // per_hw_bytes)
    if HW <= max_hw:
        tile_hw = HW
    elif HW % 128 == 0:
        # Largest multiple-of-128 divisor of HW that fits the block budget.
        k = HW // 128
        cap = max(1, max_hw // 128)
        best = 1
        for d in range(1, k + 1):
            if k % d == 0 and d <= cap:
                best = d
        tile_hw = best * 128
    else:
        # HW not a multiple of 128 and too big for one block: use a 128-wide
        # multiple and let Pallas mask the ragged edge (cheaper than padding).
        tile_hw = max(128, (max_hw // 128) * 128)

    # --- batch tiling (cdiv grid, ragged last block masked) -------------------
    per_image_bytes = c_pad * tile_hw * itemsize
    tile_n = int(max(1, min(N, block_target_bytes // max(per_image_bytes, 1))))
    grid_n = pl.cdiv(N, tile_n)
    grid_hw = pl.cdiv(HW, tile_hw)

    # v7x has 2 TensorCores: make sure there are >= 2 grid steps to shard.
    if grid_n * grid_hw < 2:
        if N >= 2:
            tile_n = -(-N // 2)
            grid_n = pl.cdiv(N, tile_n)
        elif tile_hw % 256 == 0:
            tile_hw //= 2
            grid_hw = pl.cdiv(HW, tile_hw)

    # --- honest VMEM budget ----------------------------------------------------
    in_block = tile_n * c_pad * tile_hw * itemsize
    out_block = in_block
    f32_temps = 2 * tile_n * c_pad * tile_hw * 4     # x32 + pre-cast result
    vmem_est = 2 * (in_block + out_block) + f32_temps + (2 << 20)
    vmem_limit = int(min(max(vmem_est, 16 << 20), 48 << 20))

    ab = jnp.concatenate(
        [jnp.ravel(jnp.asarray(alpha)), jnp.ravel(jnp.asarray(beta))]
    ).astype(jnp.float32)

    out = pl.pallas_call(
        functools.partial(_normalization_kernel, eps=float(eps)),
        out_shape=jax.ShapeDtypeStruct((N, C, HW), x.dtype),
        grid=(grid_n, grid_hw),
        in_specs=[
            pl.BlockSpec(memory_space=pltpu.MemorySpace.SMEM),        # [alpha, beta]
            pl.BlockSpec((tile_n, C, tile_hw), lambda i, j: (i, 0, j)),
        ],
        out_specs=pl.BlockSpec((tile_n, C, tile_hw), lambda i, j: (i, 0, j)),
        compiler_params=pltpu.CompilerParams(
            dimension_semantics=("parallel", "parallel"),
            vmem_limit_bytes=vmem_limit),
    )(ab, xf)
    return out.reshape(N, C, H, W)


def _reference_normalization(x, alpha, beta, eps=1e-12):
    """Pure-JAX mirror of F.normalize(x, dim=1) * alpha + beta."""
    norm = jnp.sqrt(jnp.sum(x * x, axis=1, keepdims=True))
    y = x / jnp.maximum(norm, eps)
    a = jnp.ravel(jnp.asarray(alpha))[0]
    b = jnp.ravel(jnp.asarray(beta))[0]
    return y * a + b


if __name__ == "__main__":
    key = jax.random.PRNGKey(0)
    N, C, H, W = 2, 4, 16, 16
    x = jax.random.normal(key, (N, C, H, W), dtype=jnp.float32)

    # Module init values: alpha = ones(1), beta = zeros(1).
    alpha = jnp.ones((1,), jnp.float32)
    beta = jnp.zeros((1,), jnp.float32)

    y = jax.block_until_ready(normalization(x, alpha, beta))
    y_ref = _reference_normalization(x, alpha, beta)
    assert y.shape == (N, C, H, W)
    assert jnp.allclose(y, y_ref, atol=1e-5, rtol=1e-5)

    # Non-trivial alpha/beta reuse the same compiled kernel (runtime SMEM scalars).
    alpha2 = jnp.full((1,), 1.5, jnp.float32)
    beta2 = jnp.full((1,), -0.25, jnp.float32)
    y2 = jax.block_until_ready(normalization(x, alpha2, beta2))
    y2_ref = _reference_normalization(x, alpha2, beta2)
    assert jnp.allclose(y2, y2_ref, atol=1e-5, rtol=1e-5)

    # Awkward shape: odd N (ragged batch blocks) and non-128-multiple HW.
    x3 = jax.random.normal(jax.random.PRNGKey(1), (3, 3, 7, 9), dtype=jnp.float32)
    y3 = jax.block_until_ready(normalization(x3, alpha2, beta2))
    y3_ref = _reference_normalization(x3, alpha2, beta2)
    assert jnp.allclose(y3, y3_ref, atol=1e-5, rtol=1e-5)

    print("KERNEL_OK")
</pallas_src>

<mosaic_0001>
module attributes {stable_mosaic.version = 11 : i64} {
  func.func @_normalization_kernel(%arg0: i32, %arg1: i32, %arg2: memref<2xf32, #tpu.memory_space<smem>>, %arg3: memref<1x4x256xf32, #tpu.memory_space<vmem>>, %arg4: memref<1x4x256xf32, #tpu.memory_space<vmem>>) attributes {dimension_semantics = [#tpu.dimension_semantics<parallel>, #tpu.dimension_semantics<parallel>], iteration_bounds = array<i64: 2, 1>, scalar_prefetch = 0 : i64, scratch_operands = 0 : i64, tpu.core_type = #tpu.core_type<tc>, window_params = [{transform_indices = @transform_0, window_bounds = array<i64: 2>}, {transform_indices = @transform_1, window_bounds = array<i64: 1, 4, 256>}, {transform_indices = @transform_2, window_bounds = array<i64: 1, 4, 256>}]} {
    %c0 = arith.constant 0 : index
    %c0_0 = arith.constant 0 : index
    %c0_1 = arith.constant 0 : index
    %0 = vector.load %arg3[%c0, %c0_0, %c0_1] : memref<1x4x256xf32, #tpu.memory_space<vmem>>, vector<1x4x256xf32>
    %1 = arith.mulf %0, %0 : vector<1x4x256xf32>
    %cst = arith.constant dense<0.000000e+00> : vector<1x256xf32>
    %2 = vector.multi_reduction <add>, %1, %cst [1] : vector<1x4x256xf32> to vector<1x256xf32>
    %3 = vector.shape_cast %2 : vector<1x256xf32> to vector<1x1x256xf32>
    %4 = math.rsqrt %3 : vector<1x1x256xf32>
    %cst_2 = arith.constant 9.99999995E+11 : f32
    %5 = vector.broadcast %cst_2 : f32 to vector<1x1x256xf32>
    %6 = arith.minimumf %4, %5 : vector<1x1x256xf32>
    %c0_3 = arith.constant 0 : index
    %7 = memref.load %arg2[%c0_3] : memref<2xf32, #tpu.memory_space<smem>>
    %c1 = arith.constant 1 : index
    %8 = memref.load %arg2[%c1] : memref<2xf32, #tpu.memory_space<smem>>
    %9 = vector.broadcast %7 : f32 to vector<1x1x256xf32>
    %10 = arith.mulf %9, %6 : vector<1x1x256xf32>
    %c0_4 = arith.constant 0 : index
    %c0_5 = arith.constant 0 : index
    %c0_6 = arith.constant 0 : index
    %11 = vector.load %arg3[%c0_4, %c0_5, %c0_6] : memref<1x4x256xf32, #tpu.memory_space<vmem>>, vector<1x4x256xf32>
    %12 = vector.broadcast %10 : vector<1x1x256xf32> to vector<1x4x256xf32>
    %13 = arith.mulf %11, %12 : vector<1x4x256xf32>
    %14 = vector.broadcast %8 : f32 to vector<1x4x256xf32>
    %15 = arith.addf %13, %14 : vector<1x4x256xf32>
    %c0_7 = arith.constant 0 : index
    %c0_8 = arith.constant 0 : index
    %c0_9 = arith.constant 0 : index
    %16 = vector.load %arg4[%c0_7, %c0_8, %c0_9] : memref<1x4x256xf32, #tpu.memory_space<vmem>>, vector<1x4x256xf32>
    tpu.vector_store %arg4[%c0_7, %c0_8, %c0_9], %15 {strides = array<i32>} : memref<1x4x256xf32, #tpu.memory_space<vmem>>, vector<1x4x256xf32>,
    return
  }
  func.func @transform_0(%arg0: i32, %arg1: i32) -> i32 {
    %c0_i32 = arith.constant 0 : i32
    %c0_i32_0 = arith.constant 0 : i32
    return %c0_i32 : i32
  }
  func.func @transform_1(%arg0: i32, %arg1: i32) -> (i32, i32, i32) {
    %c0_i32 = arith.constant 0 : i32
    %c0_i32_0 = arith.constant 0 : i32
    return %arg0, %c0_i32, %arg1 : i32, i32, i32
  }
  func.func @transform_2(%arg0: i32, %arg1: i32) -> (i32, i32, i32) {
    %c0_i32 = arith.constant 0 : i32
    %c0_i32_0 = arith.constant 0 : i32
    return %arg0, %c0_i32, %arg1 : i32, i32, i32
  }
}

</mosaic_0001>

<bundles_post_ra>
// kernel: tpu_custom_call.1
= control target key start
LH: loop header
LB: loop body
LE: loop exit
PB: predicated region body
PF: predicated region fallthrough
CT: control target
= control target key end

     0   :  { %7 = vsyncpa [#allocation5], 0  ;;  %s768_s0 = inlined_call_operand.hbm [shape: f32[2], index: 0, kind: input, shape index: {}]   ;;  %s769_s1 = inlined_call_operand.hbm [shape: f32[2,4,256], index: 1, kind: input, shape index: {}]   ;;  %s770_s2 = inlined_call_operand.hbm [shape: f32[2,4,256], index: 2, kind: output, shape index: {}]  }
   0x1   :  { %8 = vsyncpa [#allocation3], 0 }
   0x2   :  { %10 = vsyncpa [#allocation3 + $0x1], 0 }
   0x3   :  { %11 = vsyncpa [#allocation4], 0 }
   0x4   :  { %13 = vsyncpa [#allocation4 + $0x1], 0  ;;  %s616_s9 = smov 0   ;;  %s618_s10 = smov 0  }
   0x5   :  { %s620_s11 = smov 0   ;;  %s622_s12 = smov 0  }
   0x6   :  { %s624_s13 = smov 0   ;;  %s626_s14 = smov 0  }
   0x7 LB: > { %s370_s15 = sadd.s32 4294967295, %s598_s14   ;;  %s371_s16 = sadd.s32 4294967294, %s598_s14   ;;  %s598_s14 = sphi %s626_s14, %s19_s14   ;;  %s594_s13 = sphi %s624_s13, %s782_s13   ;;  %s590_s12 = sphi %s622_s12, %s781_s12   ;;  %s586_s11 = sphi %s620_s11, %s780_s11   ;;  %s582_s10 = sphi %s618_s10, %s779_s10   ;;  %s578_s9 = sphi %s616_s9, %s778_s9  }
   0x8   : > { %p74_p0 = scmp.ne.s32.totalorder %s582_s10, %s578_s9  ;;  %p650_p1 = scmp.eq.s32.totalorder %s370_s15, 0 }
   0x9   : > { %p654_p2 = scmp.eq.s32.totalorder %s370_s15, 1  ;;  %p106_p3 = scmp.eq.s32.totalorder %s371_s16, 1 }
   0xa   : > { %p660_p4 = por %p650_p1, %p74_p0  ;;  %p372_p5 = scmp.ge.s32.totalorder %s598_s14, 1 }
   0xb   : > { %p665_p6 = por %p106_p3, %p74_p0  ;;  %p113_p7 = scmp.lt.s32.totalorder %s598_s14, 3 }
   0xc   : > { %s125_s23 = sshll.u32 %s768_s0, 4  ;;  %s31_s25 = sadd.s32 1, %s594_s13  ;;  %s126_s23 = int_to_ptr.hbm [resolvable:$true] %s125_s23 }
   0xd   : > { %p673_p8 = pnand %p372_p5, %p113_p7  ;;  %s61_s26 = sadd.s32 1, %s586_s11 }
   0xe   : > { %p33_p12 = scmp.ge.s32.totalorder %s31_s25, 2  ;;  %s600_s27 = smov [#allocation2]  }
   0xf   : > { %p398_p10 = pneg %p673_p8  ;;  %p68_p13 = scmp.ne.s32.totalorder %s586_s11, %s582_s10 }
  0x10   : > { %s784_s25 = smov (%p33_p12, %s31_s25), 0  ;;  %p69_p0 = scmp.eq.s32.totalorder %s598_s14, 0 }
  0x11   : > { %p399_p11 = pnand %p398_p10, %p650_p1  ;;  %s56_s28 = ssub.s32 %s594_s13, %s784_s25 }
  0x12   : > { %p411_p3 = scmp.lt.s32.totalorder %s598_s14, 2  ;;  %p59_p5 = scmp.eq.s32.totalorder %s56_s28, 0 }
  0x13   : > { %401 = dma.hbm_to_smem (!%p399_p11), %s126_s23, 16, %s600_s27, [#allocation5]  }
  0x14   : > { %p70_p7 = por %p69_p0, %p68_p13  ;;  %p694_p9 = por %p654_p2, %p68_p13 }
  0x15   : > { %s136_s30 = sand.u32 1, %s586_s11   ;;  %s388_s5 = sshll.u32 %s594_s13, 3 }
  0x16   : > { %s700_s3 = scalar_select %p59_p5, %s586_s11, %s61_s26  }
  0x17   : > { %s375_s4 = sshll.u32 %s136_s30, 3  ;;  %s147_s8 = scalar_lea.hbm %s769_s1, %s388_s5 }
  0x18   : > { %s140_s15 = scalar_lea.vmem [#allocation6], %s375_s4  ;;  %s149_s21 = sshll.u32 %s147_s8, 4  ;;  %s150_s21 = int_to_ptr.hbm [resolvable:$true] %s149_s21 }
  0x19   : > { %s151_s16 = sshll.u32 %s140_s15, 4  ;;  %p403_p10 = pnand %p411_p3, %p70_p7  ;;  %s152_s16 = int_to_ptr.vmem [resolvable:$true] %s151_s16 }
  0x1a   : > { %s137_s18 = scalar_lea.sflag [#allocation3], %s136_s30  ;;  %160 = sbr.rel (%p673_p8) target bundleno = 95 (0x5f), region = 28 }
  0x1b   : > { %405 = dma.hbm_to_vmem [thread:$0]  (!%p403_p10), %s150_s21, 128, %s152_s16, %s137_s18  }
  0x1f   : > { %565 = dma.done.wait (%p650_p1), [#allocation5], 16  }
  0x20   : > { %567 = vsyncadd (%p650_p1), [#allocation5], 4294967280  ;;  %s715_s22 = sand.u32 1, %s582_s10  }
  0x21   : > { %s380_s23 = sshll.u32 %s715_s22, 3  ;;  %s168_s26 = scalar_lea.sflag [#allocation3], %s715_s22 }
  0x22   : > { %s171_s27 = scalar_lea.vmem [#allocation6], %s380_s23 }
  0x23   : > { %569 = dma.done.wait (%p660_p4), %s168_s26, 128  }
  0x24   : > { %571 = vsyncadd (%p660_p4), %s168_s26, 4294967168 }
  0x25   : > { %177 = sfence }
  0x26   : > { %v196_v0 = vld [vmem:[%s171_s27] sm:$0xff]  ;;  %vm204_vm0 = vcmask 1043456   ;;  %s241_s17 = sld [smem:[#allocation2]]  ;;  %s389_s24 = sshll.u32 %s590_s12, 3 }
  0x27   : > { %v197_v1 = vmul.f32 %v196_v0, %v196_v0  ;;  %s382_s19 = sld [smem:[#allocation2 + $0x1]]  ;;  %s269_s4 = scalar_lea.hbm %s770_s2, %s389_s24 }
  0x28   : > { %s193_s5 = scalar_lea.vmem [#allocation7], %s380_s23  ;;  %s273_s7 = sshll.u32 %s269_s4, 4  ;;  %s274_s7 = int_to_ptr.hbm [resolvable:$true] %s273_s7 }
  0x29   : > { %199 = vst [vmem:[#allocation1] ss:$2 sm:$0xff] %v197_v1  ;;  %s271_s6 = sshll.u32 %s193_s5, 4  ;;  %s256_s12 = scalar_lea.sflag [#allocation4], %s715_s22  ;;  %s272_s6 = int_to_ptr.vmem [resolvable:$true] %s271_s6 }
  0x2a   : > { %s526_s8 = sshra.s32 %s274_s7, 4  ;;  %s532_s18 = scalar_lea.hbm %s770_s2, 16  ;;  %s527_s8 = int_to_ptr.hbm [resolvable:$true] %s526_s8 }
  0x2b   : > { %s528_s15 = scalar_lea.hbm %s527_s8, 8  ;;  %p533_p8 = scmp.lt.s32.totalorder %s527_s8, %s770_s2 }
  0x2c   : > { %v243_v32 = vstv %s241_s17  ;;  %p529_p1 = scmp.ne.s32.totalorder %s527_s8, %s528_s15  ;;  %p534_p11 = scmp.lt.s32.totalorder %s532_s18, %s528_s15 }
  0x2d   : > { %v252_v39 = vstv %s382_s19 }
  0x2e   : > { %p530_p2 = pnand %p529_p1, %p694_p9  ;;  %p535_p12 = por %p534_p11, %p533_p8 }
  0x30   : > { %v200_v2 = vld.sshfl [vmem:[#allocation1] sm:$0xff pattern:$0x75316420]  ;;  %v201_v3 = vld.sshfl [vmem:[#allocation1 + $0x8] sm:$0xff pattern:$0x75316420]  ;;  %p531_p4 = pneg %p530_p2 }
  0x31   : > { %v205_v4 = vsel %vm204_vm0, %v200_v2, 0.0  ;;  %v212_v5 = vsel %vm204_vm0, %v201_v3, 0.0 }
  0x32   : > { %v206_v6 = vrot.slane %v205_v4, 4  ;;  %v213_v7 = vrot.slane %v212_v5, 4  ;;  %p536_p13 = pnand %p535_p12, %p531_p4 }
  0x34   : > { %v207_v8 = vadd.f32 %v206_v6, %v205_v4  ;;  %v214_v9 = vadd.f32 %v213_v7, %v212_v5 }
  0x36   : > { %v208_v10 = vrot.slane %v207_v8, 2  ;;  %v215_v11 = vrot.slane %v214_v9, 2 }
  0x38   : > { %v209_v12 = vadd.f32 %v208_v10, %v207_v8  ;;  %v216_v13 = vadd.f32 %v215_v11, %v214_v9 }
  0x3a   : > { %v210_v14 = vrot.slane %v209_v12, 1  ;;  %v217_v15 = vrot.slane %v216_v13, 1 }
  0x3c   : > { %v211_v16 = vadd.f32 %v210_v14, %v209_v12  ;;  %v218_v17 = vadd.f32 %v217_v15, %v216_v13 }
  0x3e   : > { %463 = vrsqrt.f32 %v211_v16  ;;  %vm225_vm3 = vweird.f32 %v211_v16  ;;  %vm235_vm5 = vweird.f32 %v218_v17 }
  0x3f   : > { %465 = vrsqrt.f32 %v218_v17 }
  0x44   : > { %v464_v18 = vpop.eup %463 }
  0x45   : > { %v466_v19 = vpop.eup %465  ;;  %v220_v20 = vmul.f32 %v464_v18, %v211_v16  ;;  %vm226_vm1 = vweird.f32 %v464_v18 }
  0x46   : > { %v230_v21 = vmul.f32 %v466_v19, %v218_v17  ;;  %vm236_vm2 = vweird.f32 %v466_v19  ;;  %vm227_vm4 = vmor %vm225_vm3, %vm226_vm1 }
  0x47   : > { %v221_v22 = vmul.f32 %v464_v18, %v220_v20  ;;  %vm237_vm6 = vmor %vm235_vm5, %vm236_vm2 }
  0x48   : > { %v231_v23 = vmul.f32 %v466_v19, %v230_v21 }
  0x49   : > { %v222_v24 = vmul.f32 0.5, %v221_v22 }
  0x4a   : > { %v232_v25 = vmul.f32 0.5, %v231_v23 }
  0x4b   : > { %v223_v26 = vsub.f32 1.5, %v222_v24 }
  0x4c   : > { %v233_v27 = vsub.f32 1.5, %v232_v25 }
  0x4d   : > { %v224_v28 = vmul.f32 %v464_v18, %v223_v26 }
  0x4e   : > { %v234_v29 = vmul.f32 %v466_v19, %v233_v27 }
  0x4f   : > { %v228_v30 = vsel %vm227_vm4, %v464_v18, %v224_v28 }
  0x50   : > { %v238_v31 = vsel %vm237_vm6, %v466_v19, %v234_v29  ;;  %v239_v33 = vmin.f32 %v228_v30, 1e+12 }
  0x51   : > { %v240_v34 = vmin.f32 %v238_v31, 1e+12 }
  0x52   : > { %v244_v36 = vmul.f32 %v243_v32, %v239_v33 }
  0x53   : > { %v245_v35 = vmul.f32 %v243_v32, %v240_v34 }
  0x55   : > { %v248_v37 = vrot.slane %v245_v35, 4 }
  0x57   : > { %v249_v38 = vsel %vm204_vm0, %v244_v36, %v248_v37 }
  0x58   : > { %v251_v40 = vmul.f32 %v249_v38, %v196_v0 }
  0x5a   : > { %v253_v41 = vadd.f32 %v252_v39, %v251_v40 }
  0x5c   : > { %254 = vst [vmem:[%s193_s5] sm:$0xff] %v253_v41 }
  0x5d   : > { %539 = shalt.err (!%p536_p13)
}
  0x5e   : > { %396 = dma.vmem_to_hbm [thread:$0]  (%p694_p9), %s272_s6, 128, %s274_s7, %s256_s12  }
  0x5f PF: > { %s285_s22 = sand.u32 1, %s578_s9   ;;  %p777_p0 = scmp.ge.s32.totalorder %s598_s14, 2 }
  0x60   : > { %s286_s27 = scalar_lea.sflag [#allocation4], %s285_s22 }
  0x61   : > { %p407_p3 = pnand %p777_p0, %p665_p6 }
  0x63   : > { %p408_p5 = pneg %p407_p3 }
  0x65   : > { %573 = dma.done.wait (%p408_p5), %s286_s27, 128  }
  0x66   : > { %575 = vsyncadd (%p408_p5), %s286_s27, 4294967168  ;;  %s19_s14 = sadd.s32 1, %s598_s14   ;;  %s778_s9 = smov %s582_s10 }
  0x67   : > { %p16_p7 = scmp.ge.s32.totalorder %s19_s14, 4   ;;  %s779_s10 = smov %s586_s11 }
  0x68   : > { %s780_s11 = smov %s700_s3  ;;  %s781_s12 = smov %s594_s13 }
  0x69   : > { %s782_s13 = smov %s784_s25  ;;  %18 = sbr.rel (!%p16_p7) target bundleno = 7 (0x7), region = 78 }
  0x6e   :  { %292 = vsyncpa [#allocation3], 1 }
  0x6f   :  { %294 = vsyncpa [#allocation3 + $0x1], 1 }
  0x70   :  { %295 = vsyncpa [#allocation4], 1 }
  0x71   :  { %297 = vsyncpa [#allocation4 + $0x1], 1 }
  0x72   :  { %298 = vsyncpa [#allocation5], 1 }
  0x73   :  { %300 = vsyncpa [#allocation5 + $0x1], 1 }

</bundles_post_ra>
